<compile_context>
chip_gen: v5e
topology: v5e:2x2
jax: 0.10.0
libtpu: 0.0.40
codegen_flags: <defaults>
</compile_context>

<pallas_src>
import functools

import jax
import jax.numpy as jnp
from jax.experimental import pallas as pl
from jax.experimental.pallas import tpu as pltpu

LANE = 128                       # channel axes are zero-padded to the lane width
_W_OFF = 8                       # f32 sublane tile: keeps conv2 prologue stores aligned
_VMEM_LIMIT = 48 * 1024 * 1024   # explicit scoped-VMEM budget (safe on v5e/v6e/v7x)


# ------------------------------------------------------------------ helpers ---
def _round_up(x, m):
    return (x + m - 1) // m * m


def _pad_last(a, target):
    pad = target - a.shape[-1]
    if pad == 0:
        return a
    return jnp.pad(a, [(0, 0)] * (a.ndim - 1) + [(0, pad)])


def _pick_tile(spatial, cap=1024):
    """Largest multiple of 8 that divides the per-sample spatial size (<= cap)."""
    best = None
    t = 8
    while t <= min(spatial, cap):
        if spatial % t == 0:
            best = t
        t += 8
    if best is None:
        # TODO(synk): ragged spatial sizes need pl.cdiv grids + masked final tiles.
        raise ValueError("D*H*W must be a multiple of 8")
    return best


def _pick_dblk(D, HW, target=256, cap=2048):
    """Smallest divisor of D giving >= `target` matmul rows per conv2 tap."""
    divs = [d for d in range(1, D + 1) if D % d == 0]
    for d in divs:
        if target <= d * HW <= cap:
            return d
    under = [d for d in divs if d * HW <= cap]
    return max(under) if under else 1


def _bn_scale_bias(total, total_sq, count, gamma, beta, eps=1e-5):
    """Training-mode BatchNorm: per-channel batch mean / biased variance."""
    # TODO(synk): E[x^2]-E[x]^2 in f32 is cancellation-prone at very large counts;
    # consider per-tile mean subtraction if this is scaled up.
    mean = total / count
    var = jnp.maximum(total_sq / count - mean * mean, 0.0)
    scale = gamma / jnp.sqrt(var + eps)
    bias = beta - mean * scale
    return scale, bias


# ---------------------- conv 1x1x1 with BN batch-stat epilogue (conv1) --------
def _mm_stats_kernel(x_ref, w_ref, y_ref, st_ref):
    acc = jnp.dot(x_ref[...], w_ref[...], preferred_element_type=jnp.float32)
    y_ref[...] = acc.astype(y_ref.dtype)
    st_ref[0, 0:1, :] = jnp.sum(acc, axis=0, keepdims=True)
    st_ref[0, 1:2, :] = jnp.sum(acc * acc, axis=0, keepdims=True)


def conv1x1_stats(x, w, tm):
    M, K = x.shape
    Nc = w.shape[1]
    nt = M // tm
    return pl.pallas_call(
        _mm_stats_kernel,
        out_shape=(jax.ShapeDtypeStruct((M, Nc), jnp.bfloat16),
                   jax.ShapeDtypeStruct((nt, 2, Nc), jnp.float32)),
        grid=(nt,),
        in_specs=[pl.BlockSpec((tm, K), lambda i: (i, 0)),
                  pl.BlockSpec((K, Nc), lambda i: (0, 0))],
        out_specs=(pl.BlockSpec((tm, Nc), lambda i: (i, 0)),
                   pl.BlockSpec((1, 2, Nc), lambda i: (i, 0, 0))),
        compiler_params=pltpu.CompilerParams(
            dimension_semantics=("parallel",), vmem_limit_bytes=_VMEM_LIMIT),
    )(x, w)


# ---- conv 3x3x3 (stride 1, pad 1): bn1+ReLU+pad fused prologue, 27-tap MXU ----
def _conv2_kernel(x_ref, sc_ref, bi_ref, w_ref, y_ref, st_ref, zpad_ref, acc_ref,
                  *, D, H, W, dblk):
    db = pl.program_id(1)

    # Prologue (once per batch sample): apply bn1 affine + ReLU to the bf16 conv1
    # output and stage it into the zero-padded f32 VMEM scratch the taps read.
    # No HBM round trip for the post-bn1 activation or its padded copy.
    # The interior sits at W offset _W_OFF so every store is sublane-aligned.
    @pl.when(db == 0)
    def _():
        zpad_ref[...] = jnp.zeros_like(zpad_ref)
        for d in range(D):                      # static unroll, small live values
            xz = x_ref[0, d].astype(jnp.float32).reshape(H * W, -1)
            z = jnp.maximum(xz * sc_ref[...] + bi_ref[...], 0.0)
            zpad_ref[d + 1, 1:H + 1, _W_OFF:_W_OFF + W, :] = z.reshape(H, W, -1)

    # 27-tap accumulation for dblk output d-slices: each tap matmul has
    # dblk*H*W rows, accumulated into a VMEM scratch (no register spills).
    d0 = db * dblk
    acc_ref[...] = jnp.zeros_like(acc_ref)
    for kd in range(3):
        for kh in range(3):
            for kw in range(3):
                w0 = _W_OFF - 1 + kw
                patch = zpad_ref[pl.ds(d0 + kd, dblk), kh:kh + H, w0:w0 + W, :]
                patch = patch.reshape(dblk * H * W, patch.shape[-1])
                # TODO(synk): hoist this f32->bf16 cast (v5e VPU pressure) once a
                # packed-bf16 staged copy of the scratch is verified to lower.
                acc_ref[...] += jnp.dot(patch.astype(jnp.bfloat16),
                                        w_ref[kd, kh, kw],
                                        preferred_element_type=jnp.float32)

    acc = acc_ref[...]
    y_ref[...] = acc.reshape(1, dblk, H, W, acc.shape[-1]).astype(y_ref.dtype)
    st_ref[0, 0:1, :] = jnp.sum(acc, axis=0, keepdims=True)
    st_ref[0, 1:2, :] = jnp.sum(acc * acc, axis=0, keepdims=True)


def conv3x3x3_bn_fused(y1_nd, scale1, bias1, w2, dblk):
    N, D, H, W, C = y1_nd.shape
    Cout = w2.shape[-1]
    Dp, Hp, Wp = D + 2, H + 2, _W_OFF + W + 8
    nd = D // dblk
    kernel = functools.partial(_conv2_kernel, D=D, H=H, W=W, dblk=dblk)
    return pl.pallas_call(
        kernel,
        out_shape=(jax.ShapeDtypeStruct((N, D, H, W, Cout), jnp.bfloat16),
                   jax.ShapeDtypeStruct((N * nd, 2, Cout), jnp.float32)),
        grid=(N, nd),
        in_specs=[pl.BlockSpec((1, D, H, W, C), lambda n, d: (n, 0, 0, 0, 0)),
                  pl.BlockSpec((1, C), lambda n, d: (0, 0)),
                  pl.BlockSpec((1, C), lambda n, d: (0, 0)),
                  pl.BlockSpec((3, 3, 3, C, Cout), lambda n, d: (0, 0, 0, 0, 0))],
        out_specs=(pl.BlockSpec((1, dblk, H, W, Cout), lambda n, d: (n, d, 0, 0, 0)),
                   pl.BlockSpec((1, 2, Cout), lambda n, d: (n * nd + d, 0, 0))),
        scratch_shapes=[pltpu.VMEM((Dp, Hp, Wp, C), jnp.float32),   # padded post-bn1 volume
                        pltpu.VMEM((dblk * H * W, Cout), jnp.float32)],  # accumulator
        compiler_params=pltpu.CompilerParams(
            # d axis is "arbitrary": the per-sample scratch filled at db==0 is
            # reused by later db steps of the same sample.
            dimension_semantics=("parallel", "arbitrary"),
            vmem_limit_bytes=_VMEM_LIMIT),
    )(y1_nd, scale1.reshape(1, C), bias1.reshape(1, C), w2)


# -------- bn2 affine + ReLU fused into conv 1x1x1 (+ BN3/SE-pool stats) -------
def _affine_mm_stats_kernel(x_ref, sc_ref, bi_ref, w_ref, y_ref, st_ref):
    z = jnp.maximum(x_ref[...].astype(jnp.float32) * sc_ref[...] + bi_ref[...], 0.0)
    acc = jnp.dot(z.astype(jnp.bfloat16), w_ref[...],
                  preferred_element_type=jnp.float32)
    y_ref[...] = acc.astype(y_ref.dtype)
    st_ref[0, 0:1, :] = jnp.sum(acc, axis=0, keepdims=True)
    st_ref[0, 1:2, :] = jnp.sum(acc * acc, axis=0, keepdims=True)


def affine_conv1x1_stats(x, scale, bias, w, tm):
    M, K = x.shape
    Nc = w.shape[1]
    nt = M // tm
    return pl.pallas_call(
        _affine_mm_stats_kernel,
        out_shape=(jax.ShapeDtypeStruct((M, Nc), jnp.bfloat16),
                   jax.ShapeDtypeStruct((nt, 2, Nc), jnp.float32)),
        grid=(nt,),
        in_specs=[pl.BlockSpec((tm, K), lambda i: (i, 0)),
                  pl.BlockSpec((1, K), lambda i: (0, 0)),
                  pl.BlockSpec((1, K), lambda i: (0, 0)),
                  pl.BlockSpec((K, Nc), lambda i: (0, 0))],
        out_specs=(pl.BlockSpec((tm, Nc), lambda i: (i, 0)),
                   pl.BlockSpec((1, 2, Nc), lambda i: (i, 0, 0))),
        compiler_params=pltpu.CompilerParams(
            dimension_semantics=("parallel",), vmem_limit_bytes=_VMEM_LIMIT),
    )(x, scale.reshape(1, K), bias.reshape(1, K), w)


# ------------------------- SE MLP: fc1 -> ReLU -> fc2 -> sigmoid --------------
def _se_mlp_kernel(p_ref, w1_ref, b1_ref, w2_ref, b2_ref, g_ref):
    h = jnp.dot(p_ref[...], w1_ref[...], preferred_element_type=jnp.float32)
    h = jnp.maximum(h + b1_ref[...], 0.0)
    z = jnp.dot(h, w2_ref[...], preferred_element_type=jnp.float32) + b2_ref[...]
    g_ref[...] = jax.nn.sigmoid(z)


def se_mlp(pooled, w1, b1, w2, b2):
    N, C = pooled.shape
    return pl.pallas_call(
        _se_mlp_kernel,
        out_shape=jax.ShapeDtypeStruct((N, C), jnp.float32),
    )(pooled, w1, b1, w2, b2)


# -------- bn3 affine + per-batch SE gate + residual add + ReLU, fully fused ----
def _fuse_kernel(y_ref, sc_ref, bi_ref, g_ref, r_ref, o_ref):
    y = y_ref[...].astype(jnp.float32) * sc_ref[...] + bi_ref[...]
    gate = g_ref[0]                                  # (1, C): this tile's batch gate
    out = jnp.maximum(y * gate + r_ref[...].astype(jnp.float32), 0.0)
    o_ref[...] = out.astype(o_ref.dtype)


def fused_bn_se_residual(y3, scale, bias, gate, residual, tm, tiles_per_batch):
    M, C = y3.shape
    nt = M // tm
    return pl.pallas_call(
        _fuse_kernel,
        out_shape=jax.ShapeDtypeStruct((M, C), jnp.bfloat16),   # bf16 final store
        grid=(nt,),
        in_specs=[pl.BlockSpec((tm, C), lambda i: (i, 0)),
                  pl.BlockSpec((1, C), lambda i: (0, 0)),
                  pl.BlockSpec((1, C), lambda i: (0, 0)),
                  pl.BlockSpec((1, 1, C), lambda i: (i // tiles_per_batch, 0, 0)),
                  pl.BlockSpec((tm, C), lambda i: (i, 0))],
        out_specs=pl.BlockSpec((tm, C), lambda i: (i, 0)),
        compiler_params=pltpu.CompilerParams(
            dimension_semantics=("parallel",), vmem_limit_bytes=_VMEM_LIMIT),
    )(y3, scale.reshape(1, C), bias.reshape(1, C),
      gate.reshape(-1, 1, C), residual)


# -------------------------------------------------------------- forward pass ---
def bottleneck_forward(x_ncdhw, kp, out_channels):
    """Pallas forward for Bottleneck (stride=1, downsample=None)."""
    N, Cin, D, H, W = x_ncdhw.shape
    S = D * H * W
    M = N * S
    CinP = kp["w1"].shape[0]
    PP = kp["w1"].shape[1]
    C4P = kp["w3"].shape[1]
    assert Cin == out_channels, "residual add requires in_planes == planes*expansion"
    assert CinP == C4P
    tm = _pick_tile(S)
    tiles_per_batch = S // tm
    dblk = _pick_dblk(D, H * W)

    # NCDHW -> NDHWC, zero-pad channels to the lane width, bf16, flatten (XLA glue).
    x_nd = _pad_last(jnp.transpose(x_ncdhw, (0, 2, 3, 4, 1)).astype(jnp.bfloat16), CinP)
    x_flat = x_nd.reshape(M, CinP)

    # conv1 (1x1x1); BN1 batch statistics accumulated in the kernel epilogue.
    y1, st1 = conv1x1_stats(x_flat, kp["w1"], tm)
    scale1, bias1 = _bn_scale_bias(jnp.sum(st1[:, 0], 0), jnp.sum(st1[:, 1], 0),
                                   M, kp["g1"], kp["b1"])

    # conv2 (3x3x3): bn1 affine + ReLU + zero-pad fused into the kernel prologue
    # (VMEM scratch, no HBM round trip); dblk output d-slices per step; BN2 stats
    # in the epilogue.
    y2, st2 = conv3x3x3_bn_fused(y1.reshape(N, D, H, W, PP), scale1, bias1,
                                 kp["w2"], dblk)
    scale2, bias2 = _bn_scale_bias(jnp.sum(st2[:, 0], 0), jnp.sum(st2[:, 1], 0),
                                   M, kp["g2"], kp["b2"])

    # bn2 affine + ReLU fused into conv3 (1x1x1); epilogue sums double as BN3
    # statistics and the SE global-average-pool partial sums.
    y3, st3 = affine_conv1x1_stats(y2.reshape(M, PP), scale2, bias2, kp["w3"], tm)
    scale3, bias3 = _bn_scale_bias(jnp.sum(st3[:, 0], 0), jnp.sum(st3[:, 1], 0),
                                   M, kp["g3"], kp["b3"])

    # SE: per-batch pooled mean of bn3(conv3 out) from the partial sums, then MLP.
    pooled_raw = jnp.sum(st3[:, 0].reshape(N, tiles_per_batch, C4P), axis=1) / S
    pooled = pooled_raw * scale3[None, :] + bias3[None, :]
    gate = se_mlp(pooled, kp["fc1_w"], kp["fc1_b"], kp["fc2_w"], kp["fc2_b"])

    # out = relu(bn3(y3) * gate + residual); gate indexed per batch in-kernel; bf16 store.
    out = fused_bn_se_residual(y3, scale3, bias3, gate, x_flat, tm, tiles_per_batch)

    out = out[:, :out_channels].reshape(N, D, H, W, out_channels)
    # TODO(synk): drop this NCDHW transpose when the consumer accepts channels-last.
    return jnp.transpose(out, (0, 4, 1, 2, 3))


# ---------------------------------------------------- pure-JAX mirror (check) ---
def bottleneck_reference(x_ncdhw, kp, out_channels):
    """Pure-JAX mirror of the kernel math (same bf16 storage points, same BN stats)."""
    N, Cin, D, H, W = x_ncdhw.shape
    S = D * H * W
    M = N * S
    CinP = kp["w1"].shape[0]
    PP = kp["w1"].shape[1]
    C4P = kp["w3"].shape[1]
    f32 = jnp.float32

    x_nd = _pad_last(jnp.transpose(x_ncdhw, (0, 2, 3, 4, 1)).astype(jnp.bfloat16), CinP)
    xf = x_nd.reshape(M, CinP)

    def bn(y, gamma, beta):
        return _bn_scale_bias(jnp.sum(y, 0), jnp.sum(y * y, 0), y.shape[0], gamma, beta)

    y1 = jnp.dot(xf, kp["w1"], preferred_element_type=f32)
    sc1, bi1 = bn(y1, kp["g1"], kp["b1"])
    z1 = jnp.maximum(y1.astype(jnp.bfloat16).astype(f32) * sc1 + bi1, 0.0)
    z1p = jnp.pad(z1.reshape(N, D, H, W, PP), ((0, 0), (1, 1), (1, 1), (1, 1), (0, 0)))

    y2 = jnp.zeros((N, D, H, W, PP), f32)
    for kd in range(3):
        for kh in range(3):
            for kw in range(3):
                patch = z1p[:, kd:kd + D, kh:kh + H, kw:kw + W, :].astype(jnp.bfloat16)
                y2 = y2 + jnp.einsum("ndhwc,co->ndhwo", patch, kp["w2"][kd, kh, kw],
                                     preferred_element_type=f32)
    y2f = y2.reshape(M, PP)
    sc2, bi2 = bn(y2f, kp["g2"], kp["b2"])
    z2 = jnp.maximum(y2f.astype(jnp.bfloat16).astype(f32) * sc2 + bi2, 0.0)

    y3 = jnp.dot(z2.astype(jnp.bfloat16), kp["w3"], preferred_element_type=f32)
    sc3, bi3 = bn(y3, kp["g3"], kp["b3"])

    pooled = jnp.mean(y3.reshape(N, S, C4P), axis=1) * sc3 + bi3
    h = jnp.maximum(jnp.dot(pooled, kp["fc1_w"], preferred_element_type=f32)
                    + kp["fc1_b"], 0.0)
    gate = jax.nn.sigmoid(jnp.dot(h, kp["fc2_w"], preferred_element_type=f32)
                          + kp["fc2_b"])

    y3b = y3.astype(jnp.bfloat16).astype(f32)
    gate_rows = jnp.repeat(gate, S, axis=0)
    out = jnp.maximum((y3b * sc3 + bi3) * gate_rows + xf.astype(f32), 0.0)
    out = out.astype(jnp.bfloat16)                    # mirror the kernel's bf16 store
    out = out[:, :out_channels].reshape(N, D, H, W, out_channels)
    return jnp.transpose(out, (0, 4, 1, 2, 3))


# -------------------------------------------------------------------- params ---
def make_torch_params(key, in_planes, planes, expansion=4, se_reduction=4):
    """Random parameters in native PyTorch layouts (Conv3d: (Cout, Cin, kD, kH, kW))."""
    c4 = planes * expansion
    cred = c4 // se_reduction
    ks = jax.random.split(key, 7)
    return {
        "conv1_w": jax.random.normal(ks[0], (planes, in_planes, 1, 1, 1), jnp.float32) * 0.2,
        "conv2_w": jax.random.normal(ks[1], (planes, planes, 3, 3, 3), jnp.float32) * 0.1,
        "conv3_w": jax.random.normal(ks[2], (c4, planes, 1, 1, 1), jnp.float32) * 0.2,
        "bn1_g": jnp.ones((planes,), jnp.float32), "bn1_b": jnp.zeros((planes,), jnp.float32),
        "bn2_g": jnp.ones((planes,), jnp.float32), "bn2_b": jnp.zeros((planes,), jnp.float32),
        "bn3_g": jnp.ones((c4,), jnp.float32), "bn3_b": jnp.zeros((c4,), jnp.float32),
        "fc1_w": jax.random.normal(ks[3], (cred, c4), jnp.float32) * 0.3,
        "fc1_b": jax.random.normal(ks[4], (cred,), jnp.float32) * 0.1,
        "fc2_w": jax.random.normal(ks[5], (c4, cred), jnp.float32) * 0.3,
        "fc2_b": jax.random.normal(ks[6], (c4,), jnp.float32) * 0.1,
    }


def prepare_params(tp):
    """Convert PyTorch layouts to lane-padded, matmul-ready kernel layouts."""
    planes, in_planes = tp["conv1_w"].shape[:2]
    c4 = tp["conv3_w"].shape[0]
    cred = tp["fc1_w"].shape[0]
    CinP, PP = _round_up(in_planes, LANE), _round_up(planes, LANE)
    C4P, CRP = _round_up(c4, LANE), _round_up(cred, LANE)

    def pad2(w, rows, cols):
        return jnp.pad(w, ((0, rows - w.shape[0]), (0, cols - w.shape[1])))

    def pad1(v, n):
        return jnp.pad(v, (0, n - v.shape[0]))

    w2 = jnp.transpose(tp["conv2_w"], (2, 3, 4, 1, 0))        # (kD, kH, kW, Cin, Cout)
    w2 = jnp.pad(w2, ((0, 0), (0, 0), (0, 0), (0, PP - planes), (0, PP - planes)))
    return {
        "w1": pad2(tp["conv1_w"][:, :, 0, 0, 0].T, CinP, PP).astype(jnp.bfloat16),
        "w2": w2.astype(jnp.bfloat16),
        "w3": pad2(tp["conv3_w"][:, :, 0, 0, 0].T, PP, C4P).astype(jnp.bfloat16),
        # padded gamma entries are 0 so padded channels stay exactly zero after BN.
        "g1": pad1(tp["bn1_g"], PP), "b1": pad1(tp["bn1_b"], PP),
        "g2": pad1(tp["bn2_g"], PP), "b2": pad1(tp["bn2_b"], PP),
        "g3": pad1(tp["bn3_g"], C4P), "b3": pad1(tp["bn3_b"], C4P),
        "fc1_w": pad2(tp["fc1_w"].T, C4P, CRP),
        "fc1_b": pad1(tp["fc1_b"], CRP).reshape(1, CRP),
        "fc2_w": pad2(tp["fc2_w"].T, CRP, C4P),
        "fc2_b": pad1(tp["fc2_b"], C4P).reshape(1, C4P),
    }


if __name__ == "__main__":
    key = jax.random.PRNGKey(0)
    k_x, k_p = jax.random.split(key)

    # Bottleneck(in_planes=16, planes=4), stride=1, downsample=None, expansion=4:
    # residual add is valid because 16 == 4 * 4.
    N, in_planes, planes = 2, 16, 4
    D = H = W = 8
    c4 = planes * 4
    x = jax.random.normal(k_x, (N, in_planes, D, H, W), jnp.float32)   # NCDHW (PyTorch)

    torch_params = make_torch_params(k_p, in_planes, planes)
    kp = prepare_params(torch_params)

    out = bottleneck_forward(x, kp, c4)
    out = jax.block_until_ready(out)
    assert out.shape == (N, c4, D, H, W)

    ref = bottleneck_reference(x, kp, c4)
    diff = jnp.abs(out.astype(jnp.float32) - ref.astype(jnp.float32))
    err_max = float(jnp.max(diff))
    err_mean = float(jnp.mean(diff))
    # bf16 final store: allow up to ~1 bf16 ulp on boundary-straddling elements.
    assert err_max < 1e-1 and err_mean < 2e-3, (err_max, err_mean)

    print("KERNEL_OK")
</pallas_src>

<mosaic_0001>
module attributes {stable_mosaic.version = 11 : i64} {
  func.func @_mm_stats_kernel(%arg0: i32, %arg1: memref<512x128xbf16, #tpu.memory_space<vmem>>, %arg2: memref<128x128xbf16, #tpu.memory_space<vmem>>, %arg3: memref<512x128xbf16, #tpu.memory_space<vmem>>, %arg4: memref<1x2x128xf32, #tpu.memory_space<vmem>>) attributes {dimension_semantics = [#tpu.dimension_semantics<parallel>], iteration_bounds = array<i64: 2>, scalar_prefetch = 0 : i64, scratch_operands = 0 : i64, tpu.core_type = #tpu.core_type<tc>, window_params = [{transform_indices = @transform_0, window_bounds = array<i64: 512, 128>}, {pipeline_mode = #tpu.pipeline_mode<synchronous>, transform_indices = @transform_1, window_bounds = array<i64: 128, 128>}, {transform_indices = @transform_2, window_bounds = array<i64: 512, 128>}, {transform_indices = @transform_3, window_bounds = array<i64: 1, 2, 128>}]} {
    %c0 = arith.constant 0 : index
    %c0_0 = arith.constant 0 : index
    %0 = vector.load %arg1[%c0, %c0_0] : memref<512x128xbf16, #tpu.memory_space<vmem>>, vector<512x128xbf16>
    %c0_1 = arith.constant 0 : index
    %c0_2 = arith.constant 0 : index
    %1 = vector.load %arg2[%c0_1, %c0_2] : memref<128x128xbf16, #tpu.memory_space<vmem>>, vector<128x128xbf16>
    %cst = arith.constant dense<0.000000e+00> : vector<512x128xf32>
    %2 = tpu.matmul %0, %1, %cst {dimension_numbers = #tpu.dot_dimension_numbers<[1], [0], [0], [1], [0, 0, 1, 1], [], []>} : vector<512x128xbf16>, vector<128x128xbf16>, vector<512x128xf32> -> vector<512x128xf32>
    %3 = arith.truncf %2 : vector<512x128xf32> to vector<512x128xbf16>
    %c0_3 = arith.constant 0 : index
    %c0_4 = arith.constant 0 : index
    %4 = vector.load %arg3[%c0_3, %c0_4] : memref<512x128xbf16, #tpu.memory_space<vmem>>, vector<512x128xbf16>
    tpu.vector_store %arg3[%c0_3, %c0_4], %3 {strides = array<i32>} : memref<512x128xbf16, #tpu.memory_space<vmem>>, vector<512x128xbf16>,
    %cst_5 = arith.constant dense<0.000000e+00> : vector<128xf32>
    %5 = vector.multi_reduction <add>, %2, %cst_5 [0] : vector<512x128xf32> to vector<128xf32>
    %6 = vector.shape_cast %5 : vector<128xf32> to vector<1x128xf32>
    %c0_6 = arith.constant 0 : index
    %c0_7 = arith.constant 0 : index
    %c0_8 = arith.constant 0 : index
    %7 = vector.load %arg4[%c0_6, %c0_7, %c0_8] : memref<1x2x128xf32, #tpu.memory_space<vmem>>, vector<1x1x128xf32>
    %8 = vector.shape_cast %7 : vector<1x1x128xf32> to vector<1x128xf32>
    %9 = vector.shape_cast %6 : vector<1x128xf32> to vector<1x1x128xf32>
    tpu.vector_store %arg4[%c0_6, %c0_7, %c0_8], %9 {strides = array<i32>} : memref<1x2x128xf32, #tpu.memory_space<vmem>>, vector<1x1x128xf32>,
    %10 = arith.mulf %2, %2 : vector<512x128xf32>
    %cst_9 = arith.constant dense<0.000000e+00> : vector<128xf32>
    %11 = vector.multi_reduction <add>, %10, %cst_9 [0] : vector<512x128xf32> to vector<128xf32>
    %12 = vector.shape_cast %11 : vector<128xf32> to vector<1x128xf32>
    %c0_10 = arith.constant 0 : index
    %c1 = arith.constant 1 : index
    %c0_11 = arith.constant 0 : index
    %13 = vector.load %arg4[%c0_10, %c1, %c0_11] : memref<1x2x128xf32, #tpu.memory_space<vmem>>, vector<1x1x128xf32>
    %14 = vector.shape_cast %13 : vector<1x1x128xf32> to vector<1x128xf32>
    %15 = vector.shape_cast %12 : vector<1x128xf32> to vector<1x1x128xf32>
    tpu.vector_store %arg4[%c0_10, %c1, %c0_11], %15 {strides = array<i32>} : memref<1x2x128xf32, #tpu.memory_space<vmem>>, vector<1x1x128xf32>,
    return
  }
  func.func @transform_0(%arg0: i32) -> (i32, i32) {
    %c0_i32 = arith.constant 0 : i32
    %c0_i32_0 = arith.constant 0 : i32
    return %arg0, %c0_i32 : i32, i32
  }
  func.func @transform_1(%arg0: i32) -> (i32, i32) {
    %c0_i32 = arith.constant 0 : i32
    %c0_i32_0 = arith.constant 0 : i32
    %c0_i32_1 = arith.constant 0 : i32
    return %c0_i32, %c0_i32_0 : i32, i32
  }
  func.func @transform_2(%arg0: i32) -> (i32, i32) {
    %c0_i32 = arith.constant 0 : i32
    %c0_i32_0 = arith.constant 0 : i32
    return %arg0, %c0_i32 : i32, i32
  }
  func.func @transform_3(%arg0: i32) -> (i32, i32, i32) {
    %c0_i32 = arith.constant 0 : i32
    %c0_i32_0 = arith.constant 0 : i32
    %c0_i32_1 = arith.constant 0 : i32
    return %arg0, %c0_i32, %c0_i32_0 : i32, i32, i32
  }
}

</mosaic_0001>

<bundles_post_ra>
// kernel: tpu_custom_call.1
= control target key start
LH: loop header
LB: loop body
LE: loop exit
PB: predicated region body
PF: predicated region fallthrough
CT: control target
= control target key end

     0   :  { %9 = vsyncpa [#allocation3], 0  ;;  %s2414_s0 = inlined_call_operand.hbm [shape: bf16[1024,128], index: 0, kind: input, shape index: {}]   ;;  %s2415_s1 = inlined_call_operand.hbm [shape: bf16[128,128], index: 1, kind: input, shape index: {}]   ;;  %s2416_s2 = inlined_call_operand.hbm [shape: bf16[1024,128], index: 2, kind: output, shape index: {0}]   ;;  %s2417_s3 = inlined_call_operand.hbm [shape: f32[2,2,128], index: 3, kind: output, shape index: {1}]  }
   0x1   :  { %11 = vsyncpa [#allocation3 + $0x1], 0 }
   0x2   :  { %12 = vsyncpa [#allocation6], 0 }
   0x3   :  { %13 = vsyncpa [#allocation4], 0 }
   0x4   :  { %15 = vsyncpa [#allocation4 + $0x1], 0 }
   0x5   :  { %16 = vsyncpa [#allocation9], 0 }
   0x6   :  { %18 = vsyncpa [#allocation9 + $0x1], 0  ;;  %s1884_s12 = smov 0   ;;  %s1886_s13 = smov 0  }
   0x7   :  { %s1888_s14 = smov 0   ;;  %s1890_s15 = smov 0  }
   0x8 LB: > { %s1905_s16 = sadd.s32 4294967295, %s1857_s15   ;;  %s1193_s17 = sadd.s32 4294967294, %s1857_s15   ;;  %s1857_s15 = sphi %s1890_s15, %s2427_s15   ;;  %s1853_s14 = sphi %s1888_s14, %s2426_s14   ;;  %s1849_s13 = sphi %s1886_s13, %s2425_s13   ;;  %s1845_s12 = sphi %s1884_s12, %s2424_s12  }
   0x9   : > { %p44_p0 = scmp.ne.s32.totalorder %s1849_s13, %s1845_s12  ;;  %p45_p1 = scmp.eq.s32.totalorder %s1905_s16, 0 }
   0xa   : > { %p89_p2 = scmp.eq.s32.totalorder %s1905_s16, 1  ;;  %p95_p3 = scmp.eq.s32.totalorder %s1193_s17, 1 }
   0xb   : > { %p1914_p4 = por %p45_p1, %p44_p0  ;;  %p1194_p5 = scmp.ge.s32.totalorder %s1857_s15, 1 }
   0xc   : > { %p1919_p6 = por %p95_p3, %p44_p0  ;;  %p128_p7 = scmp.lt.s32.totalorder %s1857_s15, 3 }
   0xd   : > { %s139_s22 = sshll.u32 %s2415_s1, 4  ;;  %s1859_s24 = smov [#allocation5]   ;;  %s140_s22 = int_to_ptr.hbm [resolvable:$true] %s139_s22 }
   0xe   : > { %p1927_p8 = pnand %p1194_p5, %p128_p7  ;;  %s141_s25 = sshll.u32 %s1859_s24, 4  ;;  %s142_s25 = int_to_ptr.vmem [resolvable:$true] %s141_s25 }
   0xf   : > { %s1937_s26 = sadd.s32 1, %s1857_s15   ;;  %s1860_s27 = smov 64  }
  0x10   : > { %p1639_p9 = pneg %p1927_p8  ;;  %s1861_s28 = smov 4  }
  0x11   : > { %s28_s29 = ssub.s32 %s1857_s15, %s1937_s26  ;;  %s31_s30 = sadd.s32 1, %s1853_s14 }
  0x12   : > { %p1640_p10 = pnand %p1639_p9, %p45_p1  ;;  %p29_p12 = scmp.eq.s32.totalorder %s28_s29, 0 }
  0x13   : > { %p38_p13 = scmp.ne.s32.totalorder %s1853_s14, %s1849_s13  ;;  %p39_p0 = scmp.eq.s32.totalorder %s1857_s15, 0 }
  0x14   : > { %1642 = dma.hbm_to_vmem [thread:$0]  (!%p1640_p10), %s140_s22, 1024, %s142_s25, [#allocation6], %s1860_s27, %s1860_s27, %s1861_s28  }
  0x15   : > { %s1949_s4 = scalar_select %p29_p12, %s1853_s14, %s31_s30  }
  0x16   : > { %p1953_p3 = por %p89_p2, %p38_p13  ;;  %p1655_p5 = scmp.lt.s32.totalorder %s1857_s15, 2 }
  0x17   : > { %s155_s6 = sand.u32 1, %s1853_s14   ;;  %s1372_s7 = sshll.u32 %s1857_s15, 8 }
  0x18   : > { %p40_p7 = por %p39_p0, %p38_p13  ;;  %s1197_s8 = sshll.u32 %s155_s6, 8 }
  0x19   : > { %s164_s11 = scalar_lea.hbm %s2414_s0, %s1372_s7  ;;  %s159_s20 = scalar_lea.vmem [#allocation2], %s1197_s8 }
  0x1a   : > { %s165_s17 = sshll.u32 %s164_s11, 4  ;;  %s167_s21 = sshll.u32 %s159_s20, 4  ;;  %s166_s17 = int_to_ptr.hbm [resolvable:$true] %s165_s17  ;;  %s168_s21 = int_to_ptr.vmem [resolvable:$true] %s167_s21 }
  0x1b   : > { %p1963_p9 = pnand %p1655_p5, %p40_p7  ;;  %s156_s24 = scalar_lea.sflag [#allocation3], %s155_s6 }
  0x1c   : > { %s1725_s25 = sshra.s32 %s166_s17, 4  ;;  %s1732_s8 = scalar_lea.hbm %s2414_s0, 512  ;;  %s1726_s25 = int_to_ptr.hbm [resolvable:$true] %s1725_s25 }
  0x1d   : > { %s1727_s29 = scalar_lea.hbm %s1726_s25, 256  ;;  %p1729_p10 = pneg %p1963_p9 }
  0x1e   : > { %p1728_p2 = scmp.ne.s32.totalorder %s1726_s25, %s1727_s29  ;;  %p1733_p0 = scmp.lt.s32.totalorder %s1726_s25, %s2414_s0 }
  0x1f   : > { %p1734_p5 = scmp.lt.s32.totalorder %s1732_s8, %s1727_s29 }
  0x20   : > { %p1730_p12 = pnand %p1729_p10, %p1728_p2 }
  0x21   : > { %p1735_p7 = por %p1734_p5, %p1733_p0 }
  0x22   : > { %p1731_p13 = pneg %p1730_p12 }
  0x24   : > { %p1736_p11 = pnand %p1735_p7, %p1731_p13 }
  0x26   : > { %1739 = shalt.err (!%p1736_p11)
}
  0x27   : > { %1646 = dma.hbm_to_vmem [thread:$0]  (!%p1963_p9), %s166_s17, 4096, %s168_s21, %s156_s24, %s1860_s27, %s1860_s27, %s1861_s28  }
  0x28   : > { %179 = sbr.rel (%p1927_p8) target bundleno = 441 (0x1b9), region = 28  ;;  %s1983_s6 = sand.u32 (!%p1927_p8), 1, %s1849_s13  }
  0x29   : > { %s1201_s11 = sshll.u32 (!%p1927_p8), %s1983_s6, 8  ;;  %s182_s20 = scalar_lea.sflag (!%p1927_p8), [#allocation3], %s1983_s6 }
  0x2a   : > { %s1989_s25 = scalar_lea.vmem (!%p1927_p8), [#allocation2], %s1201_s11 }
  0x2d   : > { %1828 = dma.done.wait (%p1914_p4), %s182_s20, 4096  }
  0x2e   : > { %1830 = vsyncadd (%p1914_p4), %s182_s20, 4294963200 }
  0x2f   : > { %1832 = dma.done.wait (%p45_p1), [#allocation6], 1024  }
  0x30   : > { %1834 = vsyncadd (%p45_p1), [#allocation6], 4294966272  ;;  %v1412_v0 = vld [vmem:[#allocation5 + $0x38] sm:$0xff]  ;;  %v1411_v1 = vld [vmem:[#allocation5 + $0x30] sm:$0xff]  ;;  %s2037_s18 = scalar_lea.vmem [#allocation7], %s1201_s11  ;;  %s1413_s23 = sshll.u32 %s1905_s16, 8 }
  0x31   : > { %541 = vmatpush.bf16.msra.mxu0 %v1412_v0  ;;  %1605 = vmatpush.bf16.msra.mxu1 %v1412_v0  ;;  %v1410_v2 = vld [vmem:[#allocation5 + $0x28] sm:$0xff]  ;;  %v1409_v3 = vld [vmem:[#allocation5 + $0x20] sm:$0xff]  ;;  %v1408_v4 = vld [vmem:[#allocation5 + $0x18] sm:$0xff]  ;;  %s1059_s17 = scalar_lea.hbm %s2416_s2, %s1413_s23  ;;  %s1060_s21 = sshll.u32 %s2037_s18, 4  ;;  %s2303_s21 = int_to_ptr.vmem [resolvable:$true] %s1060_s21 }
  0x32   : > { %1606 = vmatpush.bf16.msra.mxu2 %v1412_v0  ;;  %1607 = vmatpush.bf16.msra.mxu3 %v1412_v0  ;;  %v1407_v5 = vld [vmem:[#allocation5 + $0x10] sm:$0xff]  ;;  %v1406_v6 = vld [vmem:[#allocation5 + $0x8] sm:$0xff]  ;;  %v1405_v7 = vld [vmem:[#allocation5] sm:$0xff]  ;;  %s1062_s22 = sshll.u32 %s1059_s17, 4  ;;  %s1043_s24 = scalar_lea.sflag [#allocation4], %s1983_s6  ;;  %s1063_s22 = int_to_ptr.hbm [resolvable:$true] %s1062_s22 }
  0x33   : > { %v1373_v8 = vld [vmem:[%s1989_s25] sm:$0xff]  ;;  %v1374_v10 = vld [vmem:[%s1989_s25 + $0x8] sm:$0xff]  ;;  %v1375_v13 = vld [vmem:[%s1989_s25 + $0x10] sm:$0xff]  ;;  %s1769_s29 = sshra.s32 %s1063_s22, 4  ;;  %s1775_s9 = scalar_lea.hbm %s2416_s2, 512  ;;  %s1770_s29 = int_to_ptr.hbm [resolvable:$true] %s1769_s29 }
  0x34   : > { %v1381_v9 = vld [vmem:[%s1989_s25 + $0x40] sm:$0xff]  ;;  %v1382_v11 = vld [vmem:[%s1989_s25 + $0x48] sm:$0xff]  ;;  %v1383_v14 = vld [vmem:[%s1989_s25 + $0x50] sm:$0xff]  ;;  %s1771_s30 = scalar_lea.hbm %s1770_s29, 256  ;;  %p1776_p11 = scmp.lt.s32.totalorder %s1770_s29, %s2416_s2 }
  0x35   : > { %542 = vmatpush.bf16.msra.mxu0 %v1411_v1  ;;  %1608 = vmatpush.bf16.msra.mxu1 %v1411_v1  ;;  %v1389_v12 = vld [vmem:[%s1989_s25 + $0x80] sm:$0xff]  ;;  %v1390_v15 = vld [vmem:[%s1989_s25 + $0x88] sm:$0xff]  ;;  %v1376_v16 = vld [vmem:[%s1989_s25 + $0x18] sm:$0xff]  ;;  %p1772_p1 = scmp.ne.s32.totalorder %s1770_s29, %s1771_s30  ;;  %p1777_p9 = scmp.lt.s32.totalorder %s1775_s9, %s1771_s30 }
  0x36   : > { %1609 = vmatpush.bf16.msra.mxu2 %v1411_v1  ;;  %1610 = vmatpush.bf16.msra.mxu3 %v1411_v1  ;;  %v1384_v17 = vld [vmem:[%s1989_s25 + $0x58] sm:$0xff]  ;;  %v1391_v18 = vld [vmem:[%s1989_s25 + $0x90] sm:$0xff]  ;;  %v1397_v19 = vld [vmem:[%s1989_s25 + $0xc0] sm:$0xff] }
  0x37   : > { %v1377_v20 = vld [vmem:[%s1989_s25 + $0x20] sm:$0xff]  ;;  %v1392_v22 = vld [vmem:[%s1989_s25 + $0x98] sm:$0xff]  ;;  %v1398_v23 = vld [vmem:[%s1989_s25 + $0xc8] sm:$0xff]  ;;  %p1773_p4 = pnand %p1772_p1, %p1953_p3  ;;  %p1778_p2 = por %p1777_p9, %p1776_p11 }
  0x38   : > { %v1385_v21 = vld [vmem:[%s1989_s25 + $0x60] sm:$0xff]  ;;  %v1378_v24 = vld [vmem:[%s1989_s25 + $0x28] sm:$0xff]  ;;  %v1399_v27 = vld [vmem:[%s1989_s25 + $0xd0] sm:$0xff] }
  0x39   : > { %543 = vmatpush.bf16.msra.mxu0 %v1410_v2  ;;  %1611 = vmatpush.bf16.msra.mxu1 %v1410_v2  ;;  %v1386_v25 = vld [vmem:[%s1989_s25 + $0x68] sm:$0xff]  ;;  %v1393_v26 = vld [vmem:[%s1989_s25 + $0xa0] sm:$0xff]  ;;  %v1379_v28 = vld [vmem:[%s1989_s25 + $0x30] sm:$0xff]  ;;  %p1774_p8 = pneg %p1773_p4 }
  0x3a   : > { %1612 = vmatpush.bf16.msra.mxu2 %v1410_v2  ;;  %1613 = vmatpush.bf16.msra.mxu3 %v1410_v2  ;;  %v1387_v29 = vld [vmem:[%s1989_s25 + $0x70] sm:$0xff]  ;;  %v1394_v30 = vld [vmem:[%s1989_s25 + $0xa8] sm:$0xff]  ;;  %v1400_v31 = vld [vmem:[%s1989_s25 + $0xd8] sm:$0xff] }
  0x3b   : > { %v1380_v32 = vld [vmem:[%s1989_s25 + $0x38] sm:$0xff]  ;;  %v1395_v34 = vld [vmem:[%s1989_s25 + $0xb0] sm:$0xff]  ;;  %v1401_v35 = vld [vmem:[%s1989_s25 + $0xe0] sm:$0xff]  ;;  %p1779_p10 = pnand %p1778_p2, %p1774_p8 }
  0x3c   : > { %v1388_v33 = vld [vmem:[%s1989_s25 + $0x78] sm:$0xff]  ;;  %v1402_v39 = vld [vmem:[%s1989_s25 + $0xe8] sm:$0xff]  ;;  %v1403_v53 = vld [vmem:[%s1989_s25 + $0xf0] sm:$0xff] }
  0x3d   : > { %544 = vmatpush.bf16.msra.mxu0 %v1409_v3  ;;  %1614 = vmatpush.bf16.msra.mxu1 %v1409_v3  ;;  %v1396_v38 = vld [vmem:[%s1989_s25 + $0xb8] sm:$0xff] }
  0x3e   : > { %1615 = vmatpush.bf16.msra.mxu2 %v1409_v3  ;;  %1616 = vmatpush.bf16.msra.mxu3 %v1409_v3 }
  0x41   : > { %545 = vmatpush.bf16.msra.mxu0 %v1408_v4  ;;  %1617 = vmatpush.bf16.msra.mxu1 %v1408_v4 }
  0x42   : > { %1618 = vmatpush.bf16.msra.mxu2 %v1408_v4  ;;  %1619 = vmatpush.bf16.msra.mxu3 %v1408_v4 }
  0x45   : > { %546 = vmatpush.bf16.msra.mxu0 %v1407_v5  ;;  %1620 = vmatpush.bf16.msra.mxu1 %v1407_v5 }
  0x46   : > { %1621 = vmatpush.bf16.msra.mxu2 %v1407_v5  ;;  %1622 = vmatpush.bf16.msra.mxu3 %v1407_v5  ;;  %v1404_v5 = vld [vmem:[%s1989_s25 + $0xf8] sm:$0xff] }
  0x49   : > { %547 = vmatpush.bf16.msra.mxu0 %v1406_v6  ;;  %1623 = vmatpush.bf16.msra.mxu1 %v1406_v6 }
  0x4a   : > { %1624 = vmatpush.bf16.msra.mxu2 %v1406_v6  ;;  %1625 = vmatpush.bf16.msra.mxu3 %v1406_v6 }
  0x4d   : > { %548 = vmatpush.bf16.msra.mxu0 %v1405_v7  ;;  %1626 = vmatpush.bf16.msra.mxu1 %v1405_v7 }
  0x4e   : > { %1627 = vmatpush.bf16.msra.mxu2 %v1405_v7  ;;  %1628 = vmatpush.bf16.msra.mxu3 %v1405_v7 }
  0x50   : > { %549 = vmatmul.bf16.vlgmr.msra.gmra.mxu0 %v1373_v8  ;;  %589 = vmatmul.bf16.vlgmr.msra.gmra.mxu1 %v1381_v9 }
  0x51   : > { %629 = vmatmul.bf16.vlgmr.msra.gmra.mxu2 %v1389_v12  ;;  %669 = vmatmul.bf16.vlgmr.msra.gmra.mxu3 %v1397_v19 }
  0x60   : > { %554 = vmatmul.bf16.gmra.mxu0 %v1374_v10  ;;  %594 = vmatmul.bf16.gmra.mxu1 %v1382_v11 }
  0x61   : > { %634 = vmatmul.bf16.gmra.mxu2 %v1390_v15  ;;  %674 = vmatmul.bf16.gmra.mxu3 %v1398_v23 }
  0x70   : > { %559 = vmatmul.bf16.gmra.mxu0 %v1375_v13  ;;  %599 = vmatmul.bf16.gmra.mxu1 %v1383_v14 }
  0x71   : > { %639 = vmatmul.bf16.gmra.mxu2 %v1391_v18  ;;  %679 = vmatmul.bf16.gmra.mxu3 %v1399_v27 }
  0x80   : > { %564 = vmatmul.bf16.gmra.mxu0 %v1376_v16  ;;  %604 = vmatmul.bf16.gmra.mxu1 %v1384_v17 }
  0x81   : > { %644 = vmatmul.bf16.gmra.mxu2 %v1392_v22  ;;  %684 = vmatmul.bf16.gmra.mxu3 %v1400_v31 }
  0x90   : > { %569 = vmatmul.bf16.gmra.mxu0 %v1377_v20  ;;  %609 = vmatmul.bf16.gmra.mxu1 %v1385_v21 }
  0x91   : > { %649 = vmatmul.bf16.gmra.mxu2 %v1393_v26  ;;  %689 = vmatmul.bf16.gmra.mxu3 %v1401_v35 }
  0xa0   : > { %574 = vmatmul.bf16.gmra.mxu0 %v1378_v24  ;;  %614 = vmatmul.bf16.gmra.mxu1 %v1386_v25 }
  0xa1   : > { %654 = vmatmul.bf16.gmra.mxu2 %v1394_v30  ;;  %694 = vmatmul.bf16.gmra.mxu3 %v1402_v39 }
  0xb0   : > { %579 = vmatmul.bf16.gmra.mxu0 %v1379_v28  ;;  %619 = vmatmul.bf16.gmra.mxu1 %v1387_v29 }
  0xb1   : > { %659 = vmatmul.bf16.gmra.mxu2 %v1395_v34  ;;  %699 = vmatmul.bf16.gmra.mxu3 %v1403_v53 }
  0xc0   : > { %584 = vmatmul.bf16.gmra.mxu0 %v1380_v32  ;;  %624 = vmatmul.bf16.gmra.mxu1 %v1388_v33 }
  0xc1   : > { %664 = vmatmul.bf16.gmra.mxu2 %v1396_v38  ;;  %704 = vmatmul.bf16.gmra.mxu3 %v1404_v5 }
  0xcd   : > { %v550_v36 = vpop.f32.mrf.mxu0  ;;  %v2027_v37 = vpop.f32.mrf.mxu1 }
  0xce   : > { %v908_v40 = vmul.f32 %v550_v36, %v550_v36 }
  0xd4   : > { %v2048_v60 = vpop.f32.mrf.mxu2  ;;  %v2085_v20 = vpop.f32.mrf.mxu3 }
  0xd5   : > { %v552_v41 = vpop.f32.mrf.mxu0  ;;  %v2031_v42 = vpop.f32.mrf.mxu1 }
  0xd6   : > { %v1417_v43 = vpack.c.bf16 %v552_v41, %v550_v36  ;;  %v838_v44 = vadd.f32 %v552_v41, %v550_v36  ;;  %v909_v45 = vmul.f32 %v552_v41, %v552_v41  ;;  %v1457_v46 = vpack.c.bf16 %v2031_v42, %v2027_v37 }
  0xd8   : > { %1418 = vst [vmem:[%s2037_s18] sm:$0xff] %v1417_v43   ;;  %v972_v47 = vadd.f32 %v909_v45, %v908_v40 }
  0xd9   : > { %1581 = vst [vmem:[%s2037_s18 + $0x40] sm:$0xff] %v1457_v46  }
  0xdc   : > { %v2056_v2 = vpop.f32.mrf.mxu2  ;;  %v2093_v24 = vpop.f32.mrf.mxu3 }
  0xdd   : > { %v555_v48 = vpop.f32.mrf.mxu0  ;;  %v2041_v49 = vpop.f32.mrf.mxu1  ;;  %v1497_v3 = vpack.c.bf16 %v2056_v2, %v2048_v60  ;;  %v1537_v26 = vpack.c.bf16 %v2093_v24, %v2085_v20 }
  0xde   : > { %v839_v50 = vadd.f32 %v838_v44, %v555_v48  ;;  %v910_v51 = vmul.f32 %v555_v48, %v555_v48 }
  0xdf   : > { %1589 = vst [vmem:[%s2037_s18 + $0x80] sm:$0xff] %v1497_v3  }
  0xe0   : > { %v973_v52 = vadd.f32 %v972_v47, %v910_v51  ;;  %1597 = vst [vmem:[%s2037_s18 + $0xc0] sm:$0xff] %v1537_v26  }
  0xe4   : > { %v2068_v10 = vpop.f32.mrf.mxu2  ;;  %v2107_v32 = vpop.f32.mrf.mxu3 }
  0xe5   : > { %v557_v54 = vpop.f32.mrf.mxu0  ;;  %v2044_v55 = vpop.f32.mrf.mxu1 }
  0xe6   : > { %v1422_v56 = vpack.c.bf16 %v557_v54, %v555_v48  ;;  %v840_v57 = vadd.f32 %v839_v50, %v557_v54  ;;  %v911_v58 = vmul.f32 %v557_v54, %v557_v54  ;;  %v1462_v59 = vpack.c.bf16 %v2044_v55, %v2041_v49 }
  0xe8   : > { %1574 = vst [vmem:[%s2037_s18 + $0x8] sm:$0xff] %v1422_v56   ;;  %v974_v61 = vadd.f32 %v973_v52, %v911_v58 }
  0xe9   : > { %1582 = vst [vmem:[%s2037_s18 + $0x48] sm:$0xff] %v1462_v59  }
  0xec   : > { %v2074_v13 = vpop.f32.mrf.mxu2  ;;  %v2115_v36 = vpop.f32.mrf.mxu3 }
  0xed   : > { %v560_v62 = vpop.f32.mrf.mxu0  ;;  %v2052_v63 = vpop.f32.mrf.mxu1  ;;  %v1502_v14 = vpack.c.bf16 %v2074_v13, %v2068_v10  ;;  %v1542_v39 = vpack.c.bf16 %v2115_v36, %v2107_v32 }
  0xee   : > { %v2054_v0 = vadd.f32 %v840_v57, %v560_v62  ;;  %v912_v1 = vmul.f32 %v560_v62, %v560_v62 }
  0xef   : > { %1590 = vst [vmem:[%s2037_s18 + $0x88] sm:$0xff] %v1502_v14  }
  0xf0   : > { %v2060_v4 = vadd.f32 %v974_v61, %v912_v1  ;;  %1598 = vst [vmem:[%s2037_s18 + $0xc8] sm:$0xff] %v1542_v39  }
  0xf4   : > { %v2083_v19 = vpop.f32.mrf.mxu2  ;;  %v2129_v46 = vpop.f32.mrf.mxu3 }
  0xf5   : > { %v562_v6 = vpop.f32.mrf.mxu0  ;;  %v2064_v7 = vpop.f32.mrf.mxu1 }
  0xf6   : > { %v1427_v8 = vpack.c.bf16 %v562_v6, %v560_v62  ;;  %v1467_v9 = vpack.c.bf16 %v2064_v7, %v2052_v63  ;;  %v913_v52 = vmul.f32 %v562_v6, %v562_v6  ;;  %v842_v57 = vadd.f32 %v2054_v0, %v562_v6 }
  0xf8   : > { %1575 = vst [vmem:[%s2037_s18 + $0x10] sm:$0xff] %v1427_v8   ;;  %v976_v58 = vadd.f32 %v2060_v4, %v913_v52 }
  0xf9   : > { %1583 = vst [vmem:[%s2037_s18 + $0x50] sm:$0xff] %v1467_v9  }
  0xfc   : > { %v2091_v23 = vpop.f32.mrf.mxu2  ;;  %v2137_v51 = vpop.f32.mrf.mxu3 }
  0xfd   : > { %v565_v11 = vpop.f32.mrf.mxu0  ;;  %v2072_v12 = vpop.f32.mrf.mxu1  ;;  %v1507_v25 = vpack.c.bf16 %v2091_v23, %v2083_v19  ;;  %v1547_v54 = vpack.c.bf16 %v2137_v51, %v2129_v46 }
  0xfe   : > { %v914_v56 = vmul.f32 %v565_v11, %v565_v11  ;;  %v843_v61 = vadd.f32 %v842_v57, %v565_v11 }
  0xff   : > { %1591 = vst [vmem:[%s2037_s18 + $0x90] sm:$0xff] %v1507_v25  }
 0x100   : > { %1599 = vst [vmem:[%s2037_s18 + $0xd0] sm:$0xff] %v1547_v54   ;;  %v977_v62 = vadd.f32 %v976_v58, %v914_v56 }
 0x104   : > { %v2105_v31 = vpop.f32.mrf.mxu2  ;;  %v2153_v0 = vpop.f32.mrf.mxu3 }
 0x105   : > { %v567_v15 = vpop.f32.mrf.mxu0  ;;  %v2079_v16 = vpop.f32.mrf.mxu1 }
 0x106   : > { %v1432_v17 = vpack.c.bf16 %v567_v15, %v565_v11  ;;  %v1472_v18 = vpack.c.bf16 %v2079_v16, %v2072_v12  ;;  %v915_v59 = vmul.f32 %v567_v15, %v567_v15  ;;  %v844_v8 = vadd.f32 %v843_v61, %v567_v15 }
 0x108   : > { %1576 = vst [vmem:[%s2037_s18 + $0x18] sm:$0xff] %v1432_v17   ;;  %v978_v6 = vadd.f32 %v977_v62, %v915_v59 }
 0x109   : > { %1584 = vst [vmem:[%s2037_s18 + $0x58] sm:$0xff] %v1472_v18  }
 0x10c   : > { %v2113_v35 = vpop.f32.mrf.mxu2  ;;  %v2161_v54 = vpop.f32.mrf.mxu3 }
 0x10d   : > { %v570_v21 = vpop.f32.mrf.mxu0  ;;  %v2089_v22 = vpop.f32.mrf.mxu1  ;;  %v1512_v38 = vpack.c.bf16 %v2113_v35, %v2105_v31  ;;  %v1552_v57 = vpack.c.bf16 %v2161_v54, %v2153_v0 }
 0x10e   : > { %v916_v1 = vmul.f32 %v570_v21, %v570_v21  ;;  %v845_v4 = vadd.f32 %v844_v8, %v570_v21 }
 0x10f   : > { %1592 = vst [vmem:[%s2037_s18 + $0x98] sm:$0xff] %v1512_v38  }
 0x110   : > { %v979_v11 = vadd.f32 %v978_v6, %v916_v1  ;;  %1600 = vst [vmem:[%s2037_s18 + $0xd8] sm:$0xff] %v1552_v57  }
 0x114   : > { %v2127_v45 = vpop.f32.mrf.mxu2 }
 0x115   : > { %v572_v27 = vpop.f32.mrf.mxu0  ;;  %v2101_v28 = vpop.f32.mrf.mxu1 }
 0x116   : > { %v1437_v29 = vpack.c.bf16 %v572_v27, %v570_v21  ;;  %v1477_v30 = vpack.c.bf16 %v2101_v28, %v2089_v22  ;;  %v917_v18 = vmul.f32 %v572_v27, %v572_v27  ;;  %v846_v26 = vadd.f32 %v845_v4, %v572_v27 }
 0x118   : > { %1577 = vst [vmem:[%s2037_s18 + $0x20] sm:$0xff] %v1437_v29   ;;  %v980_v29 = vadd.f32 %v979_v11, %v917_v18  ;;  %v2175_v11 = vpop.f32.mrf.mxu3 }
 0x119   : > { %1585 = vst [vmem:[%s2037_s18 + $0x60] sm:$0xff] %v1477_v30  }
 0x11c   : > { %v2135_v50 = vpop.f32.mrf.mxu2 }
 0x11d   : > { %v575_v33 = vpop.f32.mrf.mxu0  ;;  %v2111_v34 = vpop.f32.mrf.mxu1  ;;  %v1517_v53 = vpack.c.bf16 %v2135_v50, %v2127_v45 }
 0x11e   : > { %v918_v25 = vmul.f32 %v575_v33, %v575_v33  ;;  %v847_v15 = vadd.f32 %v846_v26, %v575_v33 }
 0x11f   : > { %1593 = vst [vmem:[%s2037_s18 + $0xa0] sm:$0xff] %v1517_v53  }
 0x120   : > { %v981_v38 = vadd.f32 %v980_v29, %v918_v25  ;;  %v925_v29 = vmul.f32 %v2031_v42, %v2031_v42 }
 0x124   : > { %v2151_v17 = vpop.f32.mrf.mxu2 }
 0x125   : > { %v577_v40 = vpop.f32.mrf.mxu0  ;;  %v2123_v41 = vpop.f32.mrf.mxu1 }
 0x126   : > { %v1442_v43 = vpack.c.bf16 %v577_v40, %v575_v33  ;;  %v1482_v44 = vpack.c.bf16 %v2123_v41, %v2111_v34  ;;  %v919_v30 = vmul.f32 %v577_v40, %v577_v40  ;;  %v848_v52 = vadd.f32 %v847_v15, %v577_v40 }
 0x128   : > { %1578 = vst [vmem:[%s2037_s18 + $0x28] sm:$0xff] %v1442_v43   ;;  %v982_v21 = vadd.f32 %v981_v38, %v919_v30  ;;  %v926_v38 = vmul.f32 %v2041_v49, %v2041_v49 }
 0x129   : > { %1586 = vst [vmem:[%s2037_s18 + $0x68] sm:$0xff] %v1482_v44  }
 0x12c   : > { %v2159_v53 = vpop.f32.mrf.mxu2 }
 0x12d   : > { %v580_v47 = vpop.f32.mrf.mxu0  ;;  %v2133_v48 = vpop.f32.mrf.mxu1  ;;  %v1522_v27 = vpack.c.bf16 %v2159_v53, %v2151_v17 }
 0x12e   : > { %v920_v39 = vmul.f32 %v580_v47, %v580_v47  ;;  %v849_v33 = vadd.f32 %v848_v52, %v580_v47  ;;  %v927_v52 = vmul.f32 %v2044_v55, %v2044_v55 }
 0x12f   : > { %1594 = vst [vmem:[%s2037_s18 + $0xa8] sm:$0xff] %v1522_v27   ;;  %v2193_v27 = vpop.f32.mrf.mxu3 }
 0x130   : > { %v983_v58 = vadd.f32 %v982_v21, %v920_v39  ;;  %v1557_v57 = vpack.c.bf16 %v2193_v27, %v2175_v11 }
 0x132   : > { %1601 = vst [vmem:[%s2037_s18 + $0xe0] sm:$0xff] %v1557_v57  }
 0x135   : > { %v582_v3 = vpop.f32.mrf.mxu0  ;;  %v2147_v5 = vpop.f32.mrf.mxu1 }
 0x136   : > { %v1447_v9 = vpack.c.bf16 %v582_v3, %v580_v47  ;;  %v1487_v14 = vpack.c.bf16 %v2147_v5, %v2133_v48  ;;  %v921_v56 = vmul.f32 %v582_v3, %v582_v3  ;;  %v850_v61 = vadd.f32 %v849_v33, %v582_v3  ;;  %v2173_v47 = vpop.f32.mrf.mxu2 }
 0x137   : > { %v924_v3 = vmul.f32 %v2027_v37, %v2027_v37  ;;  %v937_v57 = vmul.f32 %v2147_v5, %v2147_v5 }
 0x138   : > { %1579 = vst [vmem:[%s2037_s18 + $0x30] sm:$0xff] %v1447_v9   ;;  %v984_v40 = vadd.f32 %v983_v58, %v921_v56 }
 0x139   : > { %1587 = vst [vmem:[%s2037_s18 + $0x70] sm:$0xff] %v1487_v14  }
 0x13d   : > { %v585_v43 = vpop.f32.mrf.mxu0  ;;  %v2157_v44 = vpop.f32.mrf.mxu1 }
 0x13e   : > { %v922_v59 = vmul.f32 %v585_v43, %v585_v43  ;;  %v851_v62 = vadd.f32 %v850_v61, %v585_v43  ;;  %v2191_v56 = vpop.f32.mrf.mxu2 }
 0x140   : > { %v985_v1 = vadd.f32 %v984_v40, %v922_v59  ;;  %v930_v40 = vmul.f32 %v2072_v12, %v2072_v12 }
 0x145   : > { %v587_v8 = vpop.f32.mrf.mxu0  ;;  %v2169_v9 = vpop.f32.mrf.mxu1 }
 0x146   : > { %v1452_v14 = vpack.c.bf16 %v587_v8, %v585_v43  ;;  %v852_v6 = vadd.f32 %v851_v62, %v587_v8  ;;  %v923_v18 = vmul.f32 %v587_v8, %v587_v8  ;;  %v1492_v4 = vpack.c.bf16 %v2169_v9, %v2157_v44 }
 0x147   : > { %v931_v8 = vmul.f32 %v2079_v16, %v2079_v16 }
 0x148   : > { %1580 = vst [vmem:[%s2037_s18 + $0x38] sm:$0xff] %v1452_v14   ;;  %v853_v25 = vadd.f32 %v852_v6, %v2027_v37  ;;  %v986_v26 = vadd.f32 %v985_v1, %v923_v18  ;;  %v2213_v6 = vpop.f32.mrf.mxu2  ;;  %v2215_v18 = vpop.f32.mrf.mxu3 }
 0x149   : > { %1588 = vst [vmem:[%s2037_s18 + $0x78] sm:$0xff] %v1492_v4  }
 0x14a   : > { %v854_v30 = vadd.f32 %v853_v25, %v2031_v42  ;;  %v987_v15 = vadd.f32 %v986_v26, %v924_v3  ;;  %v1527_v42 = vpack.c.bf16 %v2191_v56, %v2173_v47  ;;  %v933_v25 = vmul.f32 %v2101_v28, %v2101_v28 }
 0x14c   : > { %v855_v39 = vadd.f32 %v854_v30, %v2041_v49  ;;  %v988_v43 = vadd.f32 %v987_v15, %v925_v29  ;;  %v928_v49 = vmul.f32 %v2052_v63, %v2052_v63  ;;  %1595 = vst [vmem:[%s2037_s18 + $0xb0] sm:$0xff] %v1527_v42   ;;  %v935_v15 = vmul.f32 %v2123_v41, %v2123_v41 }
 0x14e   : > { %v856_v37 = vadd.f32 %v855_v39, %v2044_v55  ;;  %v989_v21 = vadd.f32 %v988_v43, %v926_v38  ;;  %v929_v55 = vmul.f32 %v2064_v7, %v2064_v7 }
 0x150   : > { %v857_v33 = vadd.f32 %v856_v37, %v2052_v63  ;;  %v990_v58 = vadd.f32 %v989_v21, %v927_v52  ;;  %v2229_v39 = vpop.f32.mrf.mxu2  ;;  %v2231_v43 = vpop.f32.mrf.mxu3  ;;  %v936_v37 = vmul.f32 %v2133_v48, %v2133_v48 }
 0x151   : > { %v1562_v52 = vpack.c.bf16 %v2231_v43, %v2215_v18 }
 0x152   : > { %v858_v59 = vadd.f32 %v857_v33, %v2064_v7  ;;  %v991_v61 = vadd.f32 %v990_v58, %v928_v49  ;;  %v932_v7 = vmul.f32 %v2089_v22, %v2089_v22  ;;  %v938_v58 = vmul.f32 %v2157_v44, %v2157_v44 }
 0x153   : > { %1602 = vst [vmem:[%s2037_s18 + $0xe8] sm:$0xff] %v1562_v52  }
 0x154   : > { %v992_v62 = vadd.f32 %v991_v61, %v929_v55  ;;  %v859_v1 = vadd.f32 %v858_v59, %v2072_v12 }
 0x156   : > { %v860_v63 = vadd.f32 %v859_v1, %v2079_v16  ;;  %v993_v14 = vadd.f32 %v992_v62, %v930_v40  ;;  %v934_v16 = vmul.f32 %v2111_v34, %v2111_v34  ;;  %v940_v40 = vmul.f32 %v2048_v60, %v2048_v60 }
 0x157   : > { %v941_v1 = vmul.f32 %v2056_v2, %v2056_v2 }
 0x158   : > { %v861_v4 = vadd.f32 %v860_v63, %v2089_v22  ;;  %v994_v3 = vadd.f32 %v993_v14, %v931_v8  ;;  %v2251_v61 = vpop.f32.mrf.mxu3  ;;  %v942_v63 = vmul.f32 %v2068_v10, %v2068_v10 }
 0x15a   : > { %v862_v12 = vadd.f32 %v861_v4, %v2101_v28  ;;  %v995_v26 = vadd.f32 %v994_v3, %v932_v7  ;;  %v1532_v28 = vpack.c.bf16 %v2229_v39, %v2213_v6  ;;  %v943_v7 = vmul.f32 %v2074_v13, %v2074_v13 }
 0x15c   : > { %v863_v29 = vadd.f32 %v862_v12, %v2111_v34  ;;  %v996_v30 = vadd.f32 %v995_v26, %v933_v25  ;;  %1596 = vst [vmem:[%s2037_s18 + $0xb8] sm:$0xff] %v1532_v28  }
 0x15e   : > { %v864_v22 = vadd.f32 %v863_v29, %v2123_v41  ;;  %v997_v38 = vadd.f32 %v996_v30, %v934_v16 }
 0x160   : > { %v865_v34 = vadd.f32 %v864_v22, %v2133_v48  ;;  %v998_v21 = vadd.f32 %v997_v38, %v935_v15  ;;  %v939_v48 = vmul.f32 %v2169_v9, %v2169_v9  ;;  %v2265_v3 = vpop.f32.mrf.mxu3  ;;  %v947_v22 = vmul.f32 %v2113_v35, %v2113_v35 }
 0x161   : > { %v1567_v25 = vpack.c.bf16 %v2265_v3, %v2251_v61 }
 0x162   : > { %v999_v42 = vadd.f32 %v998_v21, %v936_v37  ;;  %v866_v41 = vadd.f32 %v865_v34, %v2147_v5 }
 0x163   : > { %1603 = vst [vmem:[%s2037_s18 + $0xf0] sm:$0xff] %v1567_v25  }
 0x164   : > { %v1000_v49 = vadd.f32 %v999_v42, %v937_v57  ;;  %v867_v33 = vadd.f32 %v866_v41, %v2157_v44  ;;  %v951_v57 = vmul.f32 %v2159_v53, %v2159_v53 }
 0x166   : > { %v1001_v55 = vadd.f32 %v1000_v49, %v938_v58  ;;  %v868_v59 = vadd.f32 %v867_v33, %v2169_v9 }
 0x168   : > { %v869_v5 = vadd.f32 %v868_v59, %v2048_v60  ;;  %v1002_v62 = vadd.f32 %v1001_v55, %v939_v48  ;;  %v2283_v28 = vpop.f32.mrf.mxu3  ;;  %v952_v55 = vmul.f32 %v2173_v47, %v2173_v47  ;;  %v953_v48 = vmul.f32 %v2191_v56, %v2191_v56 }
 0x16a   : > { %v870_v44 = vadd.f32 %v869_v5, %v2056_v2  ;;  %v1003_v8 = vadd.f32 %v1002_v62, %v940_v40  ;;  %v944_v2 = vmul.f32 %v2083_v19, %v2083_v19 }
 0x16c   : > { %v871_v9 = vadd.f32 %v870_v44, %v2068_v10  ;;  %v1004_v14 = vadd.f32 %v1003_v8, %v941_v1  ;;  %v945_v10 = vmul.f32 %v2091_v23, %v2091_v23 }
 0x16e   : > { %v872_v60 = vadd.f32 %v871_v9, %v2074_v13  ;;  %v1005_v4 = vadd.f32 %v1004_v14, %v942_v63  ;;  %v946_v13 = vmul.f32 %v2105_v31, %v2105_v31 }
 0x170   : > { %v873_v12 = vadd.f32 %v872_v60, %v2083_v19  ;;  %v1006_v26 = vadd.f32 %v1005_v4, %v943_v7  ;;  %v2301_v33 = vpop.f32.mrf.mxu3 }
 0x172   : > { %v874_v16 = vadd.f32 %v873_v12, %v2091_v23  ;;  %v1007_v29 = vadd.f32 %v1006_v26, %v944_v2  ;;  %v948_v23 = vmul.f32 %v2127_v45, %v2127_v45 }
 0x174   : > { %v1008_v30 = vadd.f32 %v1007_v29, %v945_v10  ;;  %v875_v15 = vadd.f32 %v874_v16, %v2105_v31  ;;  %v949_v31 = vmul.f32 %v2135_v50, %v2135_v50 }
 0x176   : > { %v876_v19 = vadd.f32 %v875_v15, %v2113_v35  ;;  %v1009_v38 = vadd.f32 %v1008_v30, %v946_v13  ;;  %v950_v35 = vmul.f32 %v2151_v17, %v2151_v17 }
 0x178   : > { %v877_v52 = vadd.f32 %v876_v19, %v2127_v45  ;;  %v1010_v34 = vadd.f32 %v1009_v38, %v947_v22 }
 0x17a   : > { %v878_v37 = vadd.f32 %v877_v52, %v2135_v50  ;;  %v1011_v21 = vadd.f32 %v1010_v34, %v948_v23  ;;  %v1572_v50 = vpack.c.bf16 %v2301_v33, %v2283_v28 }
 0x17c   : > { %v879_v42 = vadd.f32 %v878_v37, %v2151_v17  ;;  %v1012_v45 = vadd.f32 %v1011_v21, %v949_v31  ;;  %1604 = vst [vmem:[%s2037_s18 + $0xf8] sm:$0xff] %v1572_v50  }
 0x17e   : > { %v880_v41 = vadd.f32 %v879_v42, %v2159_v53  ;;  %v1013_v49 = vadd.f32 %v1012_v45, %v950_v35 }
 0x180   : > { %v1014_v58 = vadd.f32 %v1013_v49, %v951_v57  ;;  %v881_v17 = vadd.f32 %v880_v41, %v2173_v47 }
 0x182   : > { %v1015_v59 = vadd.f32 %v1014_v58, %v952_v55  ;;  %v882_v53 = vadd.f32 %v881_v17, %v2191_v56 }
 0x183   : > { %1782 = shalt.err (!%p1779_p10)
}
 0x184   : > { %s1862_s20 = smov 64   ;;  %s1863_s25 = smov 4   ;;  %v1016_v47 = vadd.f32 %v1015_v59, %v953_v48  ;;  %v883_v56 = vadd.f32 %v882_v53, %v2213_v6  ;;  %v954_v40 = vmul.f32 %v2213_v6, %v2213_v6  ;;  %v955_v1 = vmul.f32 %v2229_v39, %v2229_v39 }
 0x185   : > { %1635 = dma.vmem_to_hbm [thread:$0]  (%p1953_p3), %s2303_s21, 4096, %s1063_s22, %s1043_s24, %s1862_s20, %s1862_s20, %s1863_s25   ;;  %v956_v44 = vmul.f32 %v2085_v20, %v2085_v20  ;;  %v957_v9 = vmul.f32 %v2093_v24, %v2093_v24  ;;  %v958_v6 = vmul.f32 %v2107_v32, %v2107_v32  ;;  %v967_v31 = vmul.f32 %v2231_v43, %v2231_v43 }
 0x186   : > { %v1017_v5 = vadd.f32 %v1016_v47, %v954_v40  ;;  %v884_v62 = vadd.f32 %v883_v56, %v2229_v39  ;;  %v959_v39 = vmul.f32 %v2115_v36, %v2115_v36  ;;  %v971_v50 = vmul.f32 %v2301_v33, %v2301_v33  ;;  %s1204_s18 = sshll.u32 %s1983_s6, 1  ;;  %s1369_s23 = sshll.u32 %s1905_s16, 1 }
 0x187   : > { %s1075_s17 = scalar_lea.hbm %s2417_s3, %s1369_s23  ;;  %s218_s21 = scalar_lea.vmem [#allocation8], %s1204_s18 }
 0x188   : > { %v885_v8 = vadd.f32 %v884_v62, %v2085_v20  ;;  %v1018_v63 = vadd.f32 %v1017_v5, %v955_v1  ;;  %v960_v20 = vmul.f32 %v2129_v46, %v2129_v46  ;;  %s1077_s22 = sshll.u32 %s218_s21, 4  ;;  %s1079_s24 = sshll.u32 %s1075_s17, 4  ;;  %s1078_s22 = int_to_ptr.vmem [resolvable:$true] %s1077_s22  ;;  %s1080_s24 = int_to_ptr.hbm [resolvable:$true] %s1079_s24 }
 0x189   : > { %s1048_s16 = scalar_lea.sflag [#allocation9], %s1983_s6  ;;  %s1797_s29 = sshra.s32 %s1080_s24, 4  ;;  %s1798_s29 = int_to_ptr.hbm [resolvable:$true] %s1797_s29 }
 0x18a   : > { %v886_v14 = vadd.f32 %v885_v8, %v2093_v24  ;;  %v1019_v7 = vadd.f32 %v1018_v63, %v956_v44  ;;  %v961_v24 = vmul.f32 %v2137_v51, %v2137_v51  ;;  %s1799_s30 = scalar_lea.hbm %s1798_s29, 2  ;;  %s1803_s9 = scalar_lea.hbm %s2417_s3, 4 }
 0x18b   : > { %p1800_p12 = scmp.ne.s32.totalorder %s1798_s29, %s1799_s30  ;;  %p1804_p5 = scmp.lt.s32.totalorder %s1798_s29, %s2417_s3 }
 0x18c   : > { %v887_v60 = vadd.f32 %v886_v14, %v2107_v32  ;;  %v1020_v4 = vadd.f32 %v1019_v7, %v957_v9  ;;  %v962_v32 = vmul.f32 %v2153_v0, %v2153_v0  ;;  %p1805_p7 = scmp.lt.s32.totalorder %s1803_s9, %s1799_s30 }
 0x18d   : > { %p1801_p13 = pnand %p1800_p12, %p1953_p3 }
 0x18e   : > { %v888_v25 = vadd.f32 %v887_v60, %v2115_v36  ;;  %v1021_v2 = vadd.f32 %v1020_v4, %v958_v6  ;;  %v963_v36 = vmul.f32 %v2161_v54, %v2161_v54  ;;  %p1806_p1 = por %p1805_p7, %p1804_p5 }
 0x18f   : > { %p1802_p0 = pneg %p1801_p13 }
 0x190   : > { %v889_v12 = vadd.f32 %v888_v25, %v2129_v46  ;;  %v1022_v26 = vadd.f32 %v1021_v2, %v959_v39  ;;  %v964_v46 = vmul.f32 %v2175_v11, %v2175_v11 }
 0x191   : > { %p1807_p4 = pnand %p1806_p1, %p1802_p0 }
 0x192   : > { %v890_v10 = vadd.f32 %v889_v12, %v2137_v51  ;;  %v1023_v16 = vadd.f32 %v1022_v26, %v960_v20  ;;  %v965_v51 = vmul.f32 %v2193_v27, %v2193_v27 }
 0x194   : > { %v1024_v29 = vadd.f32 %v1023_v16, %v961_v24  ;;  %v891_v13 = vadd.f32 %v890_v10, %v2153_v0  ;;  %v966_v0 = vmul.f32 %v2215_v18, %v2215_v18 }
 0x196   : > { %v892_v30 = vadd.f32 %v891_v13, %v2161_v54  ;;  %v1025_v15 = vadd.f32 %v1024_v29, %v962_v32 }
 0x198   : > { %v893_v22 = vadd.f32 %v892_v30, %v2175_v11  ;;  %v1026_v19 = vadd.f32 %v1025_v15, %v963_v36 }
 0x19a   : > { %v894_v38 = vadd.f32 %v893_v22, %v2193_v27  ;;  %v1027_v23 = vadd.f32 %v1026_v19, %v964_v46  ;;  %v968_v27 = vmul.f32 %v2251_v61, %v2251_v61 }
 0x19c   : > { %v895_v52 = vadd.f32 %v894_v38, %v2215_v18  ;;  %v1028_v34 = vadd.f32 %v1027_v23, %v965_v51  ;;  %v969_v18 = vmul.f32 %v2265_v3, %v2265_v3 }
 0x19e   : > { %v896_v54 = vadd.f32 %v895_v52, %v2231_v43  ;;  %v1029_v37 = vadd.f32 %v1028_v34, %v966_v0  ;;  %v970_v43 = vmul.f32 %v2283_v28, %v2283_v28 }
 0x1a0   : > { %v1030_v11 = vadd.f32 %v1029_v37, %v967_v31  ;;  %v897_v21 = vadd.f32 %v896_v54, %v2251_v61 }
 0x1a2   : > { %v1031_v35 = vadd.f32 %v1030_v11, %v968_v27  ;;  %v898_v42 = vadd.f32 %v897_v21, %v2265_v3 }
 0x1a4   : > { %v1032_v45 = vadd.f32 %v1031_v35, %v969_v18  ;;  %v899_v41 = vadd.f32 %v898_v42, %v2283_v28 }
 0x1a6   : > { %v1033_v57 = vadd.f32 %v1032_v45, %v970_v43  ;;  %v900_v49 = vadd.f32 %v899_v41, %v2301_v33 }
 0x1a8   : > { %v901_v58 = vrot.slane %v900_v49, 4  ;;  %v1034_v61 = vadd.f32 %v1033_v57, %v971_v50 }
 0x1aa   : > { %v902_v17 = vadd.f32 %v901_v58, %v900_v49  ;;  %v1035_v55 = vrot.slane %v1034_v61, 4 }
 0x1ac   : > { %v903_v59 = vrot.slane %v902_v17, 2  ;;  %v1036_v3 = vadd.f32 %v1035_v55, %v1034_v61 }
 0x1ae   : > { %v904_v53 = vadd.f32 %v903_v59, %v902_v17  ;;  %v1037_v48 = vrot.slane %v1036_v3, 2 }
 0x1b0   : > { %v905_v28 = vrot.slane %v904_v53, 1  ;;  %v1038_v47 = vadd.f32 %v1037_v48, %v1036_v3 }
 0x1b2   : > { %v906_v33 = vadd.f32 %v905_v28, %v904_v53  ;;  %v1039_v56 = vrot.slane %v1038_v47, 1 }
 0x1b4   : > { %v1040_v40 = vadd.f32 %v1039_v56, %v1038_v47  ;;  %907 = vst [vmem:[%s218_s21] sm:$0x1] %v906_v33 }
 0x1b6   : > { %1041 = vst [vmem:[%s218_s21 + $0x1] sm:$0x1] %v1040_v40 }
 0x1b7   : > { %1810 = shalt.err (!%p1807_p4)
}
 0x1b8   : > { %1636 = dma.vmem_to_hbm [thread:$0]  (%p1953_p3), %s1078_s22, 32, %s1080_s24, %s1048_s16  }
 0x1b9 PF: > { %s1091_s6 = sand.u32 1, %s1845_s12   ;;  %p2423_p8 = scmp.ge.s32.totalorder %s1857_s15, 2 }
 0x1ba   : > { %s1092_s20 = scalar_lea.sflag [#allocation4], %s1091_s6 }
 0x1bb   : > { %p1648_p11 = pnand %p2423_p8, %p1919_p6 }
 0x1bd   : > { %p1649_p9 = pneg %p1648_p11 }
 0x1bf   : > { %1836 = dma.done.wait (%p1649_p9), %s1092_s20, 4096  }
 0x1c0   : > { %1838 = vsyncadd (%p1649_p9), %s1092_s20, 4294963200  ;;  %s1102_s25 = scalar_lea.sflag [#allocation9], %s1091_s6 }
 0x1c1   : > { %1840 = dma.done.wait (%p1649_p9), %s1102_s25, 32  }
 0x1c2   : > { %1842 = vsyncadd (%p1649_p9), %s1102_s25, 4294967264  ;;  %p21_p3 = scmp.ge.s32.totalorder %s1937_s26, 4   ;;  %s2424_s12 = smov %s1849_s13 }
 0x1c3   : > { %s2425_s13 = smov %s1853_s14  ;;  %s2426_s14 = smov %s1949_s4 }
 0x1c4   : > { %s2427_s15 = smov %s1937_s26  ;;  %23 = sbr.rel (!%p21_p3) target bundleno = 8 (0x8), region = 94 }
 0x1c9   :  { %1108 = vsyncpa [#allocation3], 1 }
 0x1ca   :  { %1110 = vsyncpa [#allocation3 + $0x1], 1 }
 0x1cb   :  { %1111 = vsyncpa [#allocation6], 1 }
 0x1cc   :  { %1112 = vsyncpa [#allocation4], 1 }
 0x1cd   :  { %1114 = vsyncpa [#allocation4 + $0x1], 1 }
 0x1ce   :  { %1115 = vsyncpa [#allocation9], 1 }
 0x1cf   :  { %1117 = vsyncpa [#allocation9 + $0x1], 1 }

</bundles_post_ra>
